<compile_context>
chip_gen: v7x
topology: tpu7x:2x2x1
jax: 0.10.0
libtpu: 0.0.40
codegen_flags: <defaults>
</compile_context>

<pallas_src>
import functools

import jax
import jax.numpy as jnp
import numpy as np
from jax.experimental import pallas as pl
from jax.experimental.pallas import tpu as pltpu

LANE = 128


def _round_up(n, m):
    return ((n + m - 1) // m) * m


def critic_kernel(x_ref, w1_ref, w2_ref, wq_ref, b_ref, out_ref):
    hp = w1_ref.shape[1]   # padded hidden width (128)
    npad = wq_ref.shape[1]  # padded n_actions width (128)
    # fc1 + ReLU (f32 accumulation on the MXU, f32 epilogue on the VPU)
    h1 = jnp.dot(x_ref[...], w1_ref[...], preferred_element_type=jnp.float32)
    h1 = jnp.maximum(h1 + b_ref[0:1, :hp], 0.0)
    # fc2 + ReLU
    h2 = jnp.dot(h1, w2_ref[...], preferred_element_type=jnp.float32)
    h2 = jnp.maximum(h2 + b_ref[1:2, :hp], 0.0)
    # q head (no activation) -- lane-dense (TB, 128) store
    q = jnp.dot(h2, wq_ref[...], preferred_element_type=jnp.float32) + b_ref[2:3, :npad]
    out_ref[...] = q.astype(out_ref.dtype)


@functools.partial(jax.jit, static_argnames=("block_b",))
def critic_forward(x, params, *, block_b=512):
    """x: (B, input_dims) f32 -> (B, n_actions) f32."""
    w1, b1, w2, b2, wq, bq = params
    B, D = x.shape
    H = w1.shape[1]          # 36
    n_actions = wq.shape[1]

    HP = _round_up(H, LANE)          # 128
    NP = _round_up(n_actions, LANE)  # 128
    BW = max(HP, NP)

    # Zero-pad weights/biases to lane-dense widths (exact: padded hidden units are
    # 0 after ReLU and feed zero rows of the next weight; padded q columns are 0).
    w1p = jnp.zeros((D, HP), jnp.float32).at[:, :H].set(w1)
    w2p = jnp.zeros((HP, HP), jnp.float32).at[:H, :H].set(w2)
    wqp = jnp.zeros((HP, NP), jnp.float32).at[:H, :n_actions].set(wq)
    bias = (jnp.zeros((3, BW), jnp.float32)
            .at[0, :H].set(b1[0])
            .at[1, :H].set(b2[0])
            .at[2, :n_actions].set(bq[0]))

    # Batch tiling: weights resident, x / out streamed per tile.
    TB = min(block_b, _round_up(B, 8))
    B_pad = _round_up(B, TB)
    x_pad = x if B_pad == B else jnp.pad(x, ((0, B_pad - B), (0, 0)))
    grid = (B_pad // TB,)

    flops = 2 * B * (D * H + H * H + H * n_actions)
    bytes_accessed = 4 * (x_pad.size + w1p.size + w2p.size + wqp.size + bias.size
                          + B_pad * NP)

    out = pl.pallas_call(
        critic_kernel,
        out_shape=jax.ShapeDtypeStruct((B_pad, NP), jnp.float32),
        grid_spec=pltpu.PrefetchScalarGridSpec(
            num_scalar_prefetch=0,
            grid=grid,
            in_specs=[
                pl.BlockSpec((TB, D), lambda i: (i, 0)),    # x: streamed over batch
                pl.BlockSpec((D, HP), lambda i: (0, 0)),    # w1: resident
                pl.BlockSpec((HP, HP), lambda i: (0, 0)),   # w2: resident
                pl.BlockSpec((HP, NP), lambda i: (0, 0)),   # wq: resident
                pl.BlockSpec((3, BW), lambda i: (0, 0)),    # packed biases: resident
            ],
            out_specs=pl.BlockSpec((TB, NP), lambda i: (i, 0)),
        ),
        compiler_params=pltpu.CompilerParams(
            dimension_semantics=("parallel",),   # batch tiles independent -> megacore/v7x
        ),
        cost_estimate=pl.CostEstimate(
            flops=flops, transcendentals=0, bytes_accessed=bytes_accessed),
    )(x_pad, w1p, w2p, wqp, bias)

    return out[:B, :n_actions]


def init_params(key, input_dims, n_actions):
    """Deterministic init mirroring CriticNetwork.reset_parameters().

    hidden_init uses fan_in = weight.size(0) = out_features (PyTorch quirk),
    so lim = 1/sqrt(36) for fc1/fc2. Biases keep PyTorch's default Linear init
    (uniform(-1/sqrt(in_features), 1/sqrt(in_features))).
    """
    k = jax.random.split(key, 6)
    lim_h = 1.0 / np.sqrt(36.0)
    # weights stored as (in, out)
    w1 = jax.random.uniform(k[0], (input_dims, 36), jnp.float32, -lim_h, lim_h)
    w2 = jax.random.uniform(k[1], (36, 36), jnp.float32, -lim_h, lim_h)
    wq = jax.random.uniform(k[2], (36, n_actions), jnp.float32, -0.003, 0.003)
    b1 = jax.random.uniform(k[3], (1, 36), jnp.float32,
                            -1.0 / np.sqrt(input_dims), 1.0 / np.sqrt(input_dims))
    b2 = jax.random.uniform(k[4], (1, 36), jnp.float32,
                            -1.0 / np.sqrt(36.0), 1.0 / np.sqrt(36.0))
    bq = jax.random.uniform(k[5], (1, n_actions), jnp.float32,
                            -1.0 / np.sqrt(36.0), 1.0 / np.sqrt(36.0))
    return (w1, b1, w2, b2, wq, bq)


def reference_forward(x, params):
    w1, b1, w2, b2, wq, bq = params
    h1 = jnp.maximum(x @ w1 + b1, 0.0)
    h2 = jnp.maximum(h1 @ w2 + b2, 0.0)
    return h2 @ wq + bq


if __name__ == "__main__":
    input_dims = 16
    n_actions = 4
    batch = 8

    key = jax.random.PRNGKey(0)
    k_x, k_p = jax.random.split(key)
    params = init_params(k_p, input_dims, n_actions)
    x = jax.random.normal(k_x, (batch, input_dims), jnp.float32)

    q_val = critic_forward(x, params)
    jax.block_until_ready(q_val)

    ref = reference_forward(x, params)
    np.testing.assert_allclose(np.asarray(q_val), np.asarray(ref), rtol=1e-5, atol=1e-5)
    assert q_val.shape == (batch, n_actions)

    # Exercise a batch that is not a multiple of the tile size to check padding path.
    x2 = jax.random.normal(jax.random.PRNGKey(1), (13, input_dims), jnp.float32)
    q2 = critic_forward(x2, params)
    jax.block_until_ready(q2)
    np.testing.assert_allclose(np.asarray(q2), np.asarray(reference_forward(x2, params)),
                               rtol=1e-5, atol=1e-5)

    print("KERNEL_OK")
</pallas_src>

<mosaic_0001>
module attributes {stable_mosaic.version = 11 : i64} {
  func.func @critic_kernel(%arg0: i32, %arg1: memref<8x16xf32, #tpu.memory_space<vmem>>, %arg2: memref<16x128xf32, #tpu.memory_space<vmem>>, %arg3: memref<128x128xf32, #tpu.memory_space<vmem>>, %arg4: memref<128x128xf32, #tpu.memory_space<vmem>>, %arg5: memref<3x128xf32, #tpu.memory_space<vmem>>, %arg6: memref<8x128xf32, #tpu.memory_space<vmem>>) attributes {dimension_semantics = [#tpu.dimension_semantics<parallel>], iteration_bounds = array<i64: 1>, scalar_prefetch = 0 : i64, scratch_operands = 0 : i64, tpu.core_type = #tpu.core_type<tc>, window_params = [{transform_indices = @transform_0, window_bounds = array<i64: 8, 16>}, {pipeline_mode = #tpu.pipeline_mode<synchronous>, transform_indices = @transform_1, window_bounds = array<i64: 16, 128>}, {pipeline_mode = #tpu.pipeline_mode<synchronous>, transform_indices = @transform_2, window_bounds = array<i64: 128, 128>}, {pipeline_mode = #tpu.pipeline_mode<synchronous>, transform_indices = @transform_3, window_bounds = array<i64: 128, 128>}, {pipeline_mode = #tpu.pipeline_mode<synchronous>, transform_indices = @transform_4, window_bounds = array<i64: 3, 128>}, {transform_indices = @transform_5, window_bounds = array<i64: 8, 128>}]} {
    %c0 = arith.constant 0 : index
    %c0_0 = arith.constant 0 : index
    %0 = vector.load %arg1[%c0, %c0_0] : memref<8x16xf32, #tpu.memory_space<vmem>>, vector<8x16xf32>
    %c0_1 = arith.constant 0 : index
    %c0_2 = arith.constant 0 : index
    %1 = vector.load %arg2[%c0_1, %c0_2] : memref<16x128xf32, #tpu.memory_space<vmem>>, vector<16x128xf32>
    %cst = arith.constant dense<0.000000e+00> : vector<8x128xf32>
    %2 = tpu.matmul %0, %1, %cst {dimension_numbers = #tpu.dot_dimension_numbers<[1], [0], [0], [1], [0, 0, 1, 1], [], []>} : vector<8x16xf32>, vector<16x128xf32>, vector<8x128xf32> -> vector<8x128xf32>
    %c0_3 = arith.constant 0 : index
    %c0_4 = arith.constant 0 : index
    %3 = vector.load %arg5[%c0_3, %c0_4] : memref<3x128xf32, #tpu.memory_space<vmem>>, vector<1x128xf32>
    %4 = vector.broadcast %3 : vector<1x128xf32> to vector<8x128xf32>
    %5 = arith.addf %2, %4 : vector<8x128xf32>
    %cst_5 = arith.constant 0.000000e+00 : f32
    %6 = vector.broadcast %cst_5 : f32 to vector<8x128xf32>
    %7 = arith.maximumf %5, %6 : vector<8x128xf32>
    %c0_6 = arith.constant 0 : index
    %c0_7 = arith.constant 0 : index
    %8 = vector.load %arg3[%c0_6, %c0_7] : memref<128x128xf32, #tpu.memory_space<vmem>>, vector<128x128xf32>
    %cst_8 = arith.constant dense<0.000000e+00> : vector<8x128xf32>
    %9 = tpu.matmul %7, %8, %cst_8 {dimension_numbers = #tpu.dot_dimension_numbers<[1], [0], [0], [1], [0, 0, 1, 1], [], []>} : vector<8x128xf32>, vector<128x128xf32>, vector<8x128xf32> -> vector<8x128xf32>
    %c1 = arith.constant 1 : index
    %c0_9 = arith.constant 0 : index
    %10 = vector.load %arg5[%c1, %c0_9] : memref<3x128xf32, #tpu.memory_space<vmem>>, vector<1x128xf32>
    %11 = vector.broadcast %10 : vector<1x128xf32> to vector<8x128xf32>
    %12 = arith.addf %9, %11 : vector<8x128xf32>
    %cst_10 = arith.constant 0.000000e+00 : f32
    %13 = vector.broadcast %cst_10 : f32 to vector<8x128xf32>
    %14 = arith.maximumf %12, %13 : vector<8x128xf32>
    %c0_11 = arith.constant 0 : index
    %c0_12 = arith.constant 0 : index
    %15 = vector.load %arg4[%c0_11, %c0_12] : memref<128x128xf32, #tpu.memory_space<vmem>>, vector<128x128xf32>
    %cst_13 = arith.constant dense<0.000000e+00> : vector<8x128xf32>
    %16 = tpu.matmul %14, %15, %cst_13 {dimension_numbers = #tpu.dot_dimension_numbers<[1], [0], [0], [1], [0, 0, 1, 1], [], []>} : vector<8x128xf32>, vector<128x128xf32>, vector<8x128xf32> -> vector<8x128xf32>
    %c2 = arith.constant 2 : index
    %c0_14 = arith.constant 0 : index
    %17 = vector.load %arg5[%c2, %c0_14] : memref<3x128xf32, #tpu.memory_space<vmem>>, vector<1x128xf32>
    %18 = vector.broadcast %17 : vector<1x128xf32> to vector<8x128xf32>
    %19 = arith.addf %16, %18 : vector<8x128xf32>
    %c0_15 = arith.constant 0 : index
    %c0_16 = arith.constant 0 : index
    %20 = vector.load %arg6[%c0_15, %c0_16] : memref<8x128xf32, #tpu.memory_space<vmem>>, vector<8x128xf32>
    tpu.vector_store %arg6[%c0_15, %c0_16], %19 {strides = array<i32>} : memref<8x128xf32, #tpu.memory_space<vmem>>, vector<8x128xf32>,
    return
  }
  func.func @transform_0(%arg0: i32) -> (i32, i32) {
    %c0_i32 = arith.constant 0 : i32
    %c0_i32_0 = arith.constant 0 : i32
    return %arg0, %c0_i32 : i32, i32
  }
  func.func @transform_1(%arg0: i32) -> (i32, i32) {
    %c0_i32 = arith.constant 0 : i32
    %c0_i32_0 = arith.constant 0 : i32
    %c0_i32_1 = arith.constant 0 : i32
    return %c0_i32, %c0_i32_0 : i32, i32
  }
  func.func @transform_2(%arg0: i32) -> (i32, i32) {
    %c0_i32 = arith.constant 0 : i32
    %c0_i32_0 = arith.constant 0 : i32
    %c0_i32_1 = arith.constant 0 : i32
    return %c0_i32, %c0_i32_0 : i32, i32
  }
  func.func @transform_3(%arg0: i32) -> (i32, i32) {
    %c0_i32 = arith.constant 0 : i32
    %c0_i32_0 = arith.constant 0 : i32
    %c0_i32_1 = arith.constant 0 : i32
    return %c0_i32, %c0_i32_0 : i32, i32
  }
  func.func @transform_4(%arg0: i32) -> (i32, i32) {
    %c0_i32 = arith.constant 0 : i32
    %c0_i32_0 = arith.constant 0 : i32
    %c0_i32_1 = arith.constant 0 : i32
    return %c0_i32, %c0_i32_0 : i32, i32
  }
  func.func @transform_5(%arg0: i32) -> (i32, i32) {
    %c0_i32 = arith.constant 0 : i32
    %c0_i32_0 = arith.constant 0 : i32
    return %arg0, %c0_i32 : i32, i32
  }
}

</mosaic_0001>

<bundles_post_ra>
// kernel: critic_forward.1
= control target key start
LH: loop header
LB: loop body
LE: loop exit
PB: predicated region body
PF: predicated region fallthrough
CT: control target
= control target key end

     0   :  { %v463_v0 = vmov 0.0|0.0   ;;  %vm464_vm0 = vmmov 0   ;;  %v465_v3 = vmov 0.0   ;;  %vm28_vm1 = vcmask 130048   ;;  %s633_s1 = inlined_call_operand.vmem [shape: f32[16,128], index: 1, kind: input, shape index: {}]   ;;  %s634_s2 = inlined_call_operand.vmem [shape: f32[128,128], index: 2, kind: input, shape index: {}]   ;;  %s635_s0 = inlined_call_operand.vmem [shape: f32[8,16], index: 0, kind: input, shape index: {}]   ;;  %s636_s3 = inlined_call_operand.vmem [shape: f32[128,128], index: 3, kind: input, shape index: {}]   ;;  %s637_s4 = inlined_call_operand.vmem [shape: f32[3,128], index: 4, kind: input, shape index: {}]   ;;  %s638_s5 = inlined_call_operand.vmem [shape: f32[8,128], index: 5, kind: output, shape index: {}]  }
   0x1   :  { %409 = vmatprep.subr.bf16.mxu0 %v463_v0  ;;  %v21_v1 = vld [vmem:[%s633_s1] sm:$0xff]  ;;  %v22_v2 = vld [vmem:[%s633_s1 + $0x8] sm:$0xff]  ;;  %336 = vmatprep.mubr.msk.f32.mxu0 %vm464_vm0, %v465_v3  ;;  %v105_v7 = vld [vmem:[%s634_s2 + $0x10] sm:$0xff] }
   0x2   :  { %v410_v4 = vpack.c.bf16 %v22_v2, %v21_v1  ;;  %412 = vmatprep.subr.bf16.mxu1 %v463_v0  ;;  %v103_v5 = vld [vmem:[%s634_s2] sm:$0xff]  ;;  %v104_v6 = vld [vmem:[%s634_s2 + $0x8] sm:$0xff]  ;;  %371 = vmatprep.mubr.msk.f32.mxu1 %vm464_vm0, %v465_v3  ;;  %v106_v9 = vld [vmem:[%s634_s2 + $0x18] sm:$0xff] }
   0x3   :  { %v413_v8 = vpack.c.bf16 %v104_v6, %v103_v5  ;;  %v20_v10 = vld [vmem:[%s635_s0] sm:$0xff]  ;;  %v416_v11 = vpack.c.bf16 %v106_v9, %v105_v7  ;;  %v108_v13 = vld [vmem:[%s634_s2 + $0x28] sm:$0xff]  ;;  %v109_v15 = vld [vmem:[%s634_s2 + $0x30] sm:$0xff] }
   0x4   :  { %411 = vmatpush3.bf16.msra.mxu0 %v410_v4  ;;  %v107_v12 = vld [vmem:[%s634_s2 + $0x20] sm:$0xff]  ;;  %v110_v16 = vld [vmem:[%s634_s2 + $0x38] sm:$0xff]  ;;  %v112_v19 = vld [vmem:[%s634_s2 + $0x48] sm:$0xff] }
   0x5   :  { %414 = vmatpush3.bf16.msra.mxu1 %v413_v8  ;;  %436 = vmatprep.subr.bf16.mxu0 %v463_v0  ;;  %v419_v14 = vpack.c.bf16 %v108_v13, %v107_v12  ;;  %v422_v17 = vpack.c.bf16 %v110_v16, %v109_v15  ;;  %v111_v18 = vld [vmem:[%s634_s2 + $0x40] sm:$0xff]  ;;  %v113_v21 = vld [vmem:[%s634_s2 + $0x50] sm:$0xff]  ;;  %v114_v22 = vld [vmem:[%s634_s2 + $0x58] sm:$0xff] }
   0x6   :  { %415 = vmatprep.subr.bf16.mxu1 %v463_v0  ;;  %v425_v20 = vpack.c.bf16 %v112_v19, %v111_v18  ;;  %v428_v23 = vpack.c.bf16 %v114_v22, %v113_v21  ;;  %v115_v24 = vld [vmem:[%s634_s2 + $0x60] sm:$0xff]  ;;  %v116_v25 = vld [vmem:[%s634_s2 + $0x68] sm:$0xff]  ;;  %v117_v27 = vld [vmem:[%s634_s2 + $0x70] sm:$0xff] }
   0x7   :  { %337 = vmatmul.mubr.msk.f32.vlgmr.msra.gmra.mrb[0].mxu0 %vm28_vm1, %v20_v10  ;;  %v431_v26 = vpack.c.bf16 %v116_v25, %v115_v24  ;;  %v118_v28 = vld [vmem:[%s634_s2 + $0x78] sm:$0xff]  ;;  %v195_v30 = vld [vmem:[%s636_s3] sm:$0xff]  ;;  %v196_v31 = vld [vmem:[%s636_s3 + $0x8] sm:$0xff] }
   0x8   :  { %406 = vmatprep.mubr.msk.f32.mxu0 %vm464_vm0, %v465_v3  ;;  %v434_v29 = vpack.c.bf16 %v118_v28, %v117_v27  ;;  %v197_v32 = vld [vmem:[%s636_s3 + $0x10] sm:$0xff]  ;;  %v437_v33 = vpack.c.bf16 %v196_v31, %v195_v30  ;;  %v198_v34 = vld [vmem:[%s636_s3 + $0x18] sm:$0xff]  ;;  %v199_v36 = vld [vmem:[%s636_s3 + $0x20] sm:$0xff] }
   0x9   :  { %417 = vmatpush3.bf16.msra.mxu1 %v416_v11  ;;  %v440_v35 = vpack.c.bf16 %v198_v34, %v197_v32  ;;  %v200_v37 = vld [vmem:[%s636_s3 + $0x28] sm:$0xff]  ;;  %v201_v39 = vld [vmem:[%s636_s3 + $0x30] sm:$0xff]  ;;  %v202_v40 = vld [vmem:[%s636_s3 + $0x38] sm:$0xff] }
   0xa   :  { %418 = vmatprep.subr.bf16.mxu1 %v463_v0  ;;  %438 = vmatpush3.bf16.msra.mxu0 %v437_v33  ;;  %v443_v38 = vpack.c.bf16 %v200_v37, %v199_v36  ;;  %v446_v41 = vpack.c.bf16 %v202_v40, %v201_v39  ;;  %v203_v42 = vld [vmem:[%s636_s3 + $0x40] sm:$0xff]  ;;  %v204_v43 = vld [vmem:[%s636_s3 + $0x48] sm:$0xff]  ;;  %v205_v45 = vld [vmem:[%s636_s3 + $0x50] sm:$0xff] }
   0xb   :  { %439 = vmatprep.subr.bf16.mxu0 %v463_v0  ;;  %v449_v44 = vpack.c.bf16 %v204_v43, %v203_v42  ;;  %v206_v46 = vld [vmem:[%s636_s3 + $0x58] sm:$0xff]  ;;  %v207_v48 = vld [vmem:[%s636_s3 + $0x60] sm:$0xff]  ;;  %v208_v49 = vld [vmem:[%s636_s3 + $0x68] sm:$0xff] }
   0xc   :  { %v452_v47 = vpack.c.bf16 %v206_v46, %v205_v45  ;;  %v455_v50 = vpack.c.bf16 %v208_v49, %v207_v48  ;;  %v291_v51 = vld [vmem:[%s637_s4] ss:$0 sm:$0xff]  ;;  %v209_v56 = vld [vmem:[%s636_s3 + $0x70] sm:$0xff]  ;;  %v210_v57 = vld [vmem:[%s636_s3 + $0x78] sm:$0xff] }
   0xd   :  { %420 = vmatpush3.bf16.msra.mxu1 %v419_v14  ;;  %v458_v58 = vpack.c.bf16 %v210_v57, %v209_v56  ;;  %v293_v59 = vld [vmem:[%s637_s4 + $0x1] ss:$0 sm:$0xff] }
   0xe   :  { %421 = vmatprep.subr.bf16.mxu1 %v463_v0  ;;  %441 = vmatpush3.bf16.msra.mxu0 %v440_v35 }
   0xf   :  { %442 = vmatprep.subr.bf16.mxu0 %v463_v0 }
  0x11   :  { %423 = vmatpush3.bf16.msra.mxu1 %v422_v17 }
  0x12   :  { %424 = vmatprep.subr.bf16.mxu1 %v463_v0  ;;  %444 = vmatpush3.bf16.msra.mxu0 %v443_v38 }
  0x13   :  { %445 = vmatprep.subr.bf16.mxu0 %v463_v0 }
  0x15   :  { %426 = vmatpush3.bf16.msra.mxu1 %v425_v20 }
  0x16   :  { %427 = vmatprep.subr.bf16.mxu1 %v463_v0  ;;  %447 = vmatpush3.bf16.msra.mxu0 %v446_v41 }
  0x17   :  { %448 = vmatprep.subr.bf16.mxu0 %v463_v0 }
  0x19   :  { %429 = vmatpush3.bf16.msra.mxu1 %v428_v23 }
  0x1a   :  { %430 = vmatprep.subr.bf16.mxu1 %v463_v0  ;;  %450 = vmatpush3.bf16.msra.mxu0 %v449_v44 }
  0x1b   :  { %451 = vmatprep.subr.bf16.mxu0 %v463_v0 }
  0x1d   :  { %432 = vmatpush3.bf16.msra.mxu1 %v431_v26 }
  0x1e   :  { %433 = vmatprep.subr.bf16.mxu1 %v463_v0  ;;  %453 = vmatpush3.bf16.msra.mxu0 %v452_v47 }
  0x1f   :  { %454 = vmatprep.subr.bf16.mxu0 %v463_v0 }
  0x21   :  { %435 = vmatpush3.bf16.msra.mxu1 %v434_v29 }
  0x22   :  { %456 = vmatpush3.bf16.msra.mxu0 %v455_v50 }
  0x23   :  { %457 = vmatprep.subr.bf16.mxu0 %v463_v0  ;;  %v294_v0 = vld [vmem:[%s637_s4 + $0x2] ss:$0 sm:$0xff] }
  0x26   :  { %459 = vmatpush3.bf16.msra.mxu0 %v458_v58 }
  0xda   :  { %v98_v52 = vpop.f32.mrb[0].mxu0 }
  0xdb   :  { %v99_v53 = vadd.f32 %v291_v51, %v98_v52  ;;  %v338_v54 = vpop.f32.mrb[1].mxu0 }
  0xdd   :  { %v102_v55 = vmax.f32 %v99_v53, 0.0 }
  0xdf   :  { %372 = vmatmul.mubr.f32.vlgmr.msra.gmra.mrb[0].mxu1 %v102_v55 }
 0x1b2   :  { %v190_v60 = vpop.f32.mrb[0].mxu1 }
 0x1b3   :  { %v191_v61 = vadd.f32 %v293_v59, %v190_v60  ;;  %v373_v62 = vpop.f32.mrb[1].mxu1 }
 0x1b5   :  { %v194_v63 = vmax.f32 %v191_v61, 0.0 }
 0x1b7   :  { %407 = vmatmul.mubr.f32.vlgmr.msra.gmra.mrb[2].mxu0 %v194_v63 }
 0x28a   :  { %v282_v1 = vpop.f32.mrb[2].mxu0 }
 0x28b   :  { %v283_v2 = vadd.f32 %v294_v0, %v282_v1  ;;  %v408_v3 = vpop.f32.mrb[3].mxu0 }
 0x28d   :  { %286 = vst [vmem:[%s638_s5] sm:$0xff] %v283_v2 }

</bundles_post_ra>
